<compile_context>
chip_gen: v7x
topology: tpu7x:2x2x1
jax: 0.10.0
libtpu: 0.0.40
codegen_flags: <defaults>
</compile_context>

<pallas_src>
import jax
import jax.numpy as jnp
from jax.experimental import pallas as pl
from jax.experimental.pallas import tpu as pltpu

PROJ_DIM = 128  # hidden size of the first projection Linear (fixed at 128 in the module)


def _self_attention_kernel(x_ref, mask_ref, w1_ref, b1_ref, w2t_ref, b2_ref,
                           out_ref, wts_ref):
    """Processes bt batch elements per grid step.

    x_ref    : (bt, S_pad, H)        encoder outputs (f32 or bf16 matmul dtype)
    mask_ref : (bt, 1, S_pad)        0/1 mask, lane-major in S (f32)
    w1_ref   : (H, 128)              first Linear weight, pre-transposed (x @ W1)
    b1_ref   : (1, 128)              first Linear bias (f32)
    w2t_ref  : (hops, 128)           second Linear weight, transposed
    b2_ref   : (hops, 1)             second Linear bias (column, f32)
    out_ref  : (bt, H)               pooled outputs (f32)
    wts_ref  : (bt, hops*S_pad)      attention weights, flattened lane-dense (f32)
    """
    bt, s_pad, h_dim = x_ref.shape
    hops = w2t_ref.shape[0]

    x = x_ref[...]                                    # (bt, S_pad, H)
    # S_pad % 8 == 0 is guaranteed by the wrapper -> this merge is layout-preserving.
    xm = x.reshape(bt * s_pad, h_dim)                 # merged rows fill the MXU sublanes

    # projection: Linear(H,128) -> ReLU on merged rows (f32 accumulation)
    h = jnp.dot(xm, w1_ref[...], preferred_element_type=jnp.float32) + b1_ref[...]
    h = jnp.maximum(h, 0.0)                           # (bt*S_pad, 128) f32
    h3 = h.reshape(bt, s_pad, PROJ_DIM).astype(w2t_ref.dtype)

    # second Linear, directly in (bt, hops, S) orientation; no broadcast of w2.
    energy = jnp.einsum('ok,bsk->bos', w2t_ref[...], h3,
                        preferred_element_type=jnp.float32)      # (bt, hops, S_pad)
    energy = energy + b2_ref[...][None]                          # (1, hops, 1) bcast

    # additive mask (matches the module: -9999 * (1 - mask)), broadcast over hops
    m = mask_ref[...]                                            # (bt, 1, S_pad)
    energy = energy + (-9999.0) * (1.0 - m)

    # softmax over the sequence axis == last (lane) axis; divide -> EUP reciprocal
    e = energy - jnp.max(energy, axis=-1, keepdims=True)
    p = jnp.exp(e)
    w = p * pl.reciprocal(jnp.sum(p, axis=-1, keepdims=True), approx=True)

    # lane-dense store: last dim hops*S_pad instead of S_pad
    wts_ref[...] = w.reshape(bt, hops * s_pad)

    # pooling on the VPU/XLU: pre-reduce hops (tiny sublane reduce), broadcast over H,
    # multiply with x and reduce over the S (sublane) axis -- keeps the MXU free.
    pw = jnp.sum(w, axis=1) * (1.0 / hops)            # (bt, S_pad)
    pooled = jnp.sum(x.astype(jnp.float32) * pw[:, :, None], axis=1)   # (bt, H)
    # (bt, H) store is masked when H < 128; fine for real models with H >= 128.
    out_ref[...] = pooled


def _choose_batch_tile(B, S_pad, H, hops, in_itemsize, target_block_bytes):
    """Pick a sublane-aligned batch tile sized from a VMEM budget, keeping >= 2 grid
    steps when B allows (v7x has 2 TensorCores; a 1-step grid idles one of them)."""
    per_row = (S_pad * H * in_itemsize        # x block
               + S_pad * 4                    # mask
               + hops * S_pad * 4             # weights out
               + H * 4)                       # pooled out
    bt = int(target_block_bytes // max(per_row, 1))
    bt = max(8, min(256, (bt // 8) * 8))
    if B > 8:
        max_bt_two_steps = ((-(-B // 2) + 7) // 8) * 8   # ceil(B/2) rounded up to 8
        bt = min(bt, max_bt_two_steps)
    bt = min(bt, ((B + 7) // 8) * 8)
    return max(8, bt)


def self_attention(x, mask, w1, b1, w2, b2, hops, *, matmul_dtype=jnp.float32,
                   target_block_bytes=2 << 20):
    """x: (B, S, H), mask: (B, S) of 0/1 (or None).

    Returns (outputs (B, H), weights (B, hops, S)) matching the PyTorch module.
    Weights are passed pre-transposed (w1: (H,128), w2: (128,hops)) so the kernel
    computes x @ W.  matmul_dtype=jnp.bfloat16 enables bf16 MXU inputs (f32 accum).
    """
    B, S, H = x.shape
    x = x.astype(jnp.float32)
    if mask is None:
        mask = jnp.ones((B, S), jnp.float32)
    mask = mask.astype(jnp.float32)

    # Pad S to a sublane multiple so the in-kernel merged-row reshape is copy-free;
    # padded positions get mask=0 -> ~0 attention weight (sliced off afterwards).
    S_pad = ((S + 7) // 8) * 8
    if S_pad != S:
        x = jnp.pad(x, ((0, 0), (0, S_pad - S), (0, 0)))
        mask = jnp.pad(mask, ((0, 0), (0, S_pad - S)))

    in_itemsize = jnp.dtype(matmul_dtype).itemsize
    bt = _choose_batch_tile(B, S_pad, H, hops, in_itemsize, target_block_bytes)
    B_pad = ((B + bt - 1) // bt) * bt
    if B_pad != B:
        x = jnp.pad(x, ((0, B_pad - B), (0, 0), (0, 0)))
        mask = jnp.pad(mask, ((0, B_pad - B), (0, 0)))

    # bf16 here also halves x's HBM traffic; mask/biases/softmax stay f32.
    x = x.astype(matmul_dtype)
    mask3 = mask.reshape(B_pad, 1, S_pad)
    w1m = w1.astype(matmul_dtype)                       # (H, 128)
    b1_2d = b1.reshape(1, PROJ_DIM).astype(jnp.float32)
    w2t = jnp.swapaxes(w2, 0, 1).astype(matmul_dtype)   # (hops, 128)
    b2_col = b2.reshape(hops, 1).astype(jnp.float32)

    grid = (B_pad // bt,)

    # Advisory cost estimate for the XLA scheduler.
    flops = (2 * B_pad * S_pad * (H * PROJ_DIM + PROJ_DIM * hops + H)
             + 8 * B_pad * hops * S_pad)
    transcendentals = B_pad * hops * S_pad
    bytes_accessed = (in_itemsize * (B_pad * S_pad * H + H * PROJ_DIM + PROJ_DIM * hops)
                      + 4 * (B_pad * S_pad + PROJ_DIM + hops
                             + B_pad * H + B_pad * hops * S_pad))
    cost = pl.CostEstimate(flops=int(flops), transcendentals=int(transcendentals),
                           bytes_accessed=int(bytes_accessed))

    # Generation-aware VMEM budget: 3/4 of physical VMEM (96 MiB on v5e/v6e, 48 on v7x).
    blk_bytes = (in_itemsize * (bt * S_pad * H + H * PROJ_DIM + hops * PROJ_DIM)
                 + 4 * (bt * S_pad + bt * H + bt * hops * S_pad + PROJ_DIM + hops))
    try:
        vmem_cap = int(pltpu.get_tpu_info().vmem_capacity_bytes)
    except Exception:
        vmem_cap = 64 << 20   # conservative fallback (v7x per-core VMEM)
    vmem_limit = int(min(max(2 * blk_bytes + (4 << 20), 32 << 20), (vmem_cap * 3) // 4))

    out, wts_flat = pl.pallas_call(
        _self_attention_kernel,
        out_shape=(
            jax.ShapeDtypeStruct((B_pad, H), jnp.float32),
            jax.ShapeDtypeStruct((B_pad, hops * S_pad), jnp.float32),
        ),
        grid=grid,
        in_specs=[
            pl.BlockSpec((bt, S_pad, H), lambda b: (b, 0, 0)),       # x
            pl.BlockSpec((bt, 1, S_pad), lambda b: (b, 0, 0)),       # mask (lane-major)
            pl.BlockSpec((H, PROJ_DIM), lambda b: (0, 0)),           # w1
            pl.BlockSpec((1, PROJ_DIM), lambda b: (0, 0)),           # b1
            pl.BlockSpec((hops, PROJ_DIM), lambda b: (0, 0)),        # w2^T
            pl.BlockSpec((hops, 1), lambda b: (0, 0)),               # b2 (column)
        ],
        out_specs=(
            pl.BlockSpec((bt, H), lambda b: (b, 0)),                 # pooled outputs
            pl.BlockSpec((bt, hops * S_pad), lambda b: (b, 0)),      # weights, flattened
        ),
        compiler_params=pltpu.CompilerParams(
            dimension_semantics=("parallel",),
            vmem_limit_bytes=vmem_limit,
        ),
        cost_estimate=cost,
    )(x, mask3, w1m, b1_2d, w2t, b2_col)

    wts = wts_flat.reshape(B_pad, hops, S_pad)[:B, :, :S]
    return out[:B], wts


def self_attention_ref(x, mask, w1, b1, w2, b2, hops):
    """Pure-JAX reference mirroring the PyTorch forward."""
    h = jnp.maximum(jnp.einsum('bsh,hk->bsk', x, w1) + b1, 0.0)
    energy = jnp.einsum('bsk,ko->bso', h, w2) + b2
    if mask is not None:
        energy = energy + (-9999.0 * (1.0 - mask))[..., None]
    weights = jax.nn.softmax(energy, axis=1)            # softmax over seq
    weights_t = jnp.swapaxes(weights, 1, 2)              # (B, hops, S)
    outputs = jnp.einsum('bos,bsh->boh', weights_t, x)
    outputs = jnp.sum(outputs, axis=1) / hops
    return outputs, weights_t


if __name__ == "__main__":
    key = jax.random.PRNGKey(0)
    B, S, H, HOPS = 16, 16, 32, 4

    k_x, k_m, k_w1, k_b1, k_w2, k_b2 = jax.random.split(key, 6)
    x = jax.random.normal(k_x, (B, S, H), dtype=jnp.float32)
    mask = jax.random.bernoulli(k_m, p=0.75, shape=(B, S)).astype(jnp.float32)

    # Deterministic parameter init (Linear(H,128) and Linear(128,HOPS)); weights
    # are stored pre-transposed so the kernel computes x @ W.
    w1 = jax.random.normal(k_w1, (H, PROJ_DIM), dtype=jnp.float32) * 0.1
    b1 = jax.random.normal(k_b1, (PROJ_DIM,), dtype=jnp.float32) * 0.1
    w2 = jax.random.normal(k_w2, (PROJ_DIM, HOPS), dtype=jnp.float32) * 0.1
    b2 = jax.random.normal(k_b2, (HOPS,), dtype=jnp.float32) * 0.1

    out_ref, wts_ref = self_attention_ref(x, mask, w1, b1, w2, b2, HOPS)

    # f32 path (strict check; atol slightly above 1e-3 covers the EUP approx reciprocal
    # used for the softmax normalization, ~2^-11 relative on weights <= 1).
    out, wts = self_attention(x, mask, w1, b1, w2, b2, HOPS)
    out, wts = jax.block_until_ready((out, wts))
    assert out.shape == (B, H) and wts.shape == (B, HOPS, S)
    assert jnp.allclose(out, out_ref, rtol=1e-3, atol=2e-3)
    assert jnp.allclose(wts, wts_ref, rtol=1e-3, atol=2e-3)

    # bf16-at-the-MXU path (perf-review item for v5e/v6e/v7x): looser tolerance.
    out_bf, wts_bf = self_attention(x, mask, w1, b1, w2, b2, HOPS,
                                    matmul_dtype=jnp.bfloat16)
    out_bf, wts_bf = jax.block_until_ready((out_bf, wts_bf))
    assert jnp.allclose(out_bf, out_ref, rtol=2e-2, atol=2e-2)
    assert jnp.allclose(wts_bf, wts_ref, rtol=2e-2, atol=2e-2)

    print("KERNEL_OK")
</pallas_src>

<mosaic_0001>
module attributes {stable_mosaic.version = 11 : i64} {
  func.func @_self_attention_kernel(%arg0: i32, %arg1: memref<8x16x32xf32, #tpu.memory_space<vmem>>, %arg2: memref<8x1x16xf32, #tpu.memory_space<vmem>>, %arg3: memref<32x128xf32, #tpu.memory_space<vmem>>, %arg4: memref<1x128xf32, #tpu.memory_space<vmem>>, %arg5: memref<4x128xf32, #tpu.memory_space<vmem>>, %arg6: memref<4x1xf32, #tpu.memory_space<vmem>>, %arg7: memref<8x32xf32, #tpu.memory_space<vmem>>, %arg8: memref<8x64xf32, #tpu.memory_space<vmem>>) attributes {dimension_semantics = [#tpu.dimension_semantics<parallel>], iteration_bounds = array<i64: 2>, scalar_prefetch = 0 : i64, scratch_operands = 0 : i64, tpu.core_type = #tpu.core_type<tc>, window_params = [{transform_indices = @transform_0, window_bounds = array<i64: 8, 16, 32>}, {transform_indices = @transform_1, window_bounds = array<i64: 8, 1, 16>}, {pipeline_mode = #tpu.pipeline_mode<synchronous>, transform_indices = @transform_2, window_bounds = array<i64: 32, 128>}, {pipeline_mode = #tpu.pipeline_mode<synchronous>, transform_indices = @transform_3, window_bounds = array<i64: 1, 128>}, {pipeline_mode = #tpu.pipeline_mode<synchronous>, transform_indices = @transform_4, window_bounds = array<i64: 4, 128>}, {pipeline_mode = #tpu.pipeline_mode<synchronous>, transform_indices = @transform_5, window_bounds = array<i64: 4, 1>}, {transform_indices = @transform_6, window_bounds = array<i64: 8, 32>}, {transform_indices = @transform_7, window_bounds = array<i64: 8, 64>}]} {
    %c0 = arith.constant 0 : index
    %c0_0 = arith.constant 0 : index
    %c0_1 = arith.constant 0 : index
    %0 = vector.load %arg1[%c0, %c0_0, %c0_1] : memref<8x16x32xf32, #tpu.memory_space<vmem>>, vector<8x16x32xf32>
    %1 = vector.shape_cast %0 : vector<8x16x32xf32> to vector<128x32xf32>
    %c0_2 = arith.constant 0 : index
    %c0_3 = arith.constant 0 : index
    %2 = vector.load %arg3[%c0_2, %c0_3] : memref<32x128xf32, #tpu.memory_space<vmem>>, vector<32x128xf32>
    %cst = arith.constant dense<0.000000e+00> : vector<128x128xf32>
    %3 = tpu.matmul %1, %2, %cst {dimension_numbers = #tpu.dot_dimension_numbers<[1], [0], [0], [1], [0, 0, 1, 1], [], []>} : vector<128x32xf32>, vector<32x128xf32>, vector<128x128xf32> -> vector<128x128xf32>
    %c0_4 = arith.constant 0 : index
    %c0_5 = arith.constant 0 : index
    %4 = vector.load %arg4[%c0_4, %c0_5] : memref<1x128xf32, #tpu.memory_space<vmem>>, vector<1x128xf32>
    %5 = vector.broadcast %4 : vector<1x128xf32> to vector<128x128xf32>
    %6 = arith.addf %3, %5 : vector<128x128xf32>
    %cst_6 = arith.constant 0.000000e+00 : f32
    %7 = vector.broadcast %cst_6 : f32 to vector<128x128xf32>
    %8 = arith.maximumf %6, %7 : vector<128x128xf32>
    %9 = vector.shape_cast %8 : vector<128x128xf32> to vector<8x16x128xf32>
    %c0_7 = arith.constant 0 : index
    %c0_8 = arith.constant 0 : index
    %10 = vector.load %arg5[%c0_7, %c0_8] : memref<4x128xf32, #tpu.memory_space<vmem>>, vector<4x128xf32>
    "tpu.trace_start"() <{level = 10 : i32, message = "ok,bsk->bos"}> : () -> ()
    %cst_9 = arith.constant dense<0.000000e+00> : vector<8x16x4xf32>
    %11 = tpu.matmul %9, %10, %cst_9 {dimension_numbers = #tpu.dot_dimension_numbers<[2], [1], [0, 1], [0], [0, 0, 0, 1, 1, 0], [], []>} : vector<8x16x128xf32>, vector<4x128xf32>, vector<8x16x4xf32> -> vector<8x16x4xf32>
    %12 = tpu.transpose %11, [0, 2, 1] : vector<8x16x4xf32> -> vector<8x4x16xf32>
    "tpu.trace_stop"() : () -> ()
    %c0_10 = arith.constant 0 : index
    %c0_11 = arith.constant 0 : index
    %13 = vector.load %arg6[%c0_10, %c0_11] : memref<4x1xf32, #tpu.memory_space<vmem>>, vector<4x1xf32>
    %14 = vector.shape_cast %13 : vector<4x1xf32> to vector<1x4x1xf32>
    %15 = vector.broadcast %14 : vector<1x4x1xf32> to vector<8x4x16xf32>
    %16 = arith.addf %12, %15 : vector<8x4x16xf32>
    %c0_12 = arith.constant 0 : index
    %c0_13 = arith.constant 0 : index
    %c0_14 = arith.constant 0 : index
    %17 = vector.load %arg2[%c0_12, %c0_13, %c0_14] : memref<8x1x16xf32, #tpu.memory_space<vmem>>, vector<8x1x16xf32>
    %cst_15 = arith.constant 1.000000e+00 : f32
    %18 = vector.broadcast %cst_15 : f32 to vector<8x1x16xf32>
    %19 = arith.subf %18, %17 : vector<8x1x16xf32>
    %cst_16 = arith.constant -9.999000e+03 : f32
    %20 = vector.broadcast %cst_16 : f32 to vector<8x1x16xf32>
    %21 = arith.mulf %20, %19 : vector<8x1x16xf32>
    %22 = vector.broadcast %21 : vector<8x1x16xf32> to vector<8x4x16xf32>
    %23 = arith.addf %16, %22 : vector<8x4x16xf32>
    %cst_17 = arith.constant dense<0xFF800000> : vector<8x4xf32>
    %24 = vector.multi_reduction <maximumf>, %23, %cst_17 [2] : vector<8x4x16xf32> to vector<8x4xf32>
    %25 = vector.shape_cast %24 : vector<8x4xf32> to vector<8x4x1xf32>
    %26 = vector.broadcast %25 : vector<8x4x1xf32> to vector<8x4x16xf32>
    %27 = arith.subf %23, %26 : vector<8x4x16xf32>
    %28 = math.exp %27 : vector<8x4x16xf32>
    %cst_18 = arith.constant dense<0.000000e+00> : vector<8x4xf32>
    %29 = vector.multi_reduction <add>, %28, %cst_18 [2] : vector<8x4x16xf32> to vector<8x4xf32>
    %30 = vector.shape_cast %29 : vector<8x4xf32> to vector<8x4x1xf32>
    %31 = tpu.reciprocal %30 {approx = true} : vector<8x4x1xf32> -> vector<8x4x1xf32>
    %32 = vector.broadcast %31 : vector<8x4x1xf32> to vector<8x4x16xf32>
    %33 = arith.mulf %28, %32 : vector<8x4x16xf32>
    %34 = vector.shape_cast %33 : vector<8x4x16xf32> to vector<8x64xf32>
    %c0_19 = arith.constant 0 : index
    %c0_20 = arith.constant 0 : index
    %35 = vector.load %arg8[%c0_19, %c0_20] : memref<8x64xf32, #tpu.memory_space<vmem>>, vector<8x64xf32>
    tpu.vector_store %arg8[%c0_19, %c0_20], %34 {strides = array<i32>} : memref<8x64xf32, #tpu.memory_space<vmem>>, vector<8x64xf32>,
    %cst_21 = arith.constant dense<0.000000e+00> : vector<8x16xf32>
    %36 = vector.multi_reduction <add>, %33, %cst_21 [1] : vector<8x4x16xf32> to vector<8x16xf32>
    %cst_22 = arith.constant 2.500000e-01 : f32
    %37 = vector.broadcast %cst_22 : f32 to vector<8x16xf32>
    %38 = arith.mulf %36, %37 : vector<8x16xf32>
    %39 = vector.shape_cast %38 : vector<8x16xf32> to vector<8x16x1xf32>
    %40 = vector.broadcast %39 : vector<8x16x1xf32> to vector<8x16x32xf32>
    %41 = arith.mulf %0, %40 : vector<8x16x32xf32>
    %cst_23 = arith.constant dense<0.000000e+00> : vector<8x32xf32>
    %42 = vector.multi_reduction <add>, %41, %cst_23 [1] : vector<8x16x32xf32> to vector<8x32xf32>
    %c0_24 = arith.constant 0 : index
    %c0_25 = arith.constant 0 : index
    %43 = vector.load %arg7[%c0_24, %c0_25] : memref<8x32xf32, #tpu.memory_space<vmem>>, vector<8x32xf32>
    tpu.vector_store %arg7[%c0_24, %c0_25], %42 {strides = array<i32>} : memref<8x32xf32, #tpu.memory_space<vmem>>, vector<8x32xf32>,
    return
  }
  func.func @transform_0(%arg0: i32) -> (i32, i32, i32) {
    %c0_i32 = arith.constant 0 : i32
    %c0_i32_0 = arith.constant 0 : i32
    %c0_i32_1 = arith.constant 0 : i32
    return %arg0, %c0_i32, %c0_i32_0 : i32, i32, i32
  }
  func.func @transform_1(%arg0: i32) -> (i32, i32, i32) {
    %c0_i32 = arith.constant 0 : i32
    %c0_i32_0 = arith.constant 0 : i32
    %c0_i32_1 = arith.constant 0 : i32
    return %arg0, %c0_i32, %c0_i32_0 : i32, i32, i32
  }
  func.func @transform_2(%arg0: i32) -> (i32, i32) {
    %c0_i32 = arith.constant 0 : i32
    %c0_i32_0 = arith.constant 0 : i32
    %c0_i32_1 = arith.constant 0 : i32
    return %c0_i32, %c0_i32_0 : i32, i32
  }
  func.func @transform_3(%arg0: i32) -> (i32, i32) {
    %c0_i32 = arith.constant 0 : i32
    %c0_i32_0 = arith.constant 0 : i32
    %c0_i32_1 = arith.constant 0 : i32
    return %c0_i32, %c0_i32_0 : i32, i32
  }
  func.func @transform_4(%arg0: i32) -> (i32, i32) {
    %c0_i32 = arith.constant 0 : i32
    %c0_i32_0 = arith.constant 0 : i32
    %c0_i32_1 = arith.constant 0 : i32
    return %c0_i32, %c0_i32_0 : i32, i32
  }
  func.func @transform_5(%arg0: i32) -> (i32, i32) {
    %c0_i32 = arith.constant 0 : i32
    %c0_i32_0 = arith.constant 0 : i32
    %c0_i32_1 = arith.constant 0 : i32
    return %c0_i32, %c0_i32_0 : i32, i32
  }
  func.func @transform_6(%arg0: i32) -> (i32, i32) {
    %c0_i32 = arith.constant 0 : i32
    %c0_i32_0 = arith.constant 0 : i32
    return %arg0, %c0_i32 : i32, i32
  }
  func.func @transform_7(%arg0: i32) -> (i32, i32) {
    %c0_i32 = arith.constant 0 : i32
    %c0_i32_0 = arith.constant 0 : i32
    return %arg0, %c0_i32 : i32, i32
  }
}

</mosaic_0001>

<bundles_post_ra>
// kernel: tpu_custom_call.1
= control target key start
LH: loop header
LB: loop body
LE: loop exit
PB: predicated region body
PF: predicated region fallthrough
CT: control target
= control target key end

     0   :  { %s2710_s0 = inlined_call_operand.hbm [shape: f32[16,16,32], index: 0, kind: input, shape index: {}]   ;;  %s2711_s1 = inlined_call_operand.hbm [shape: f32[16,1,16], index: 1, kind: input, shape index: {}]   ;;  %s2712_s2 = inlined_call_operand.hbm [shape: f32[32,128], index: 2, kind: input, shape index: {}]   ;;  %s2713_s3 = inlined_call_operand.vmem [shape: f32[1,128], index: 3, kind: input, shape index: {}]   ;;  %s2714_s4 = inlined_call_operand.vmem [shape: f32[4,128], index: 4, kind: input, shape index: {}]   ;;  %s2715_s5 = inlined_call_operand.vmem [shape: f32[4,1], index: 5, kind: input, shape index: {}]   ;;  %s2716_s6 = inlined_call_operand.hbm [shape: f32[16,32], index: 6, kind: output, shape index: {0}]   ;;  %s2717_s7 = inlined_call_operand.hbm [shape: f32[16,64], index: 7, kind: output, shape index: {1}]  }
   0x1   :  { %2726 = sst [smem:[#allocation19_spill]] %s2710_s0 }
   0x2   :  { %2727 = sst [smem:[#allocation20_spill]] %s2712_s2 }
   0x3   :  { %13 = vsyncpa [#allocation3], 0 }
   0x4   :  { %15 = vsyncpa [#allocation3 + $0x1], 0 }
   0x5   :  { %16 = vsyncpa [#allocation6], 0 }
   0x6   :  { %18 = vsyncpa [#allocation6 + $0x1], 0 }
   0x7   :  { %19 = vsyncpa [#allocation4], 0 }
   0x8   :  { %21 = vsyncpa [#allocation4 + $0x1], 0 }
   0x9   :  { %22 = vsyncpa [#allocation10], 0 }
   0xa   :  { %24 = vsyncpa [#allocation10 + $0x1], 0  ;;  %s2180_s24 = smov 0   ;;  %s2182_s25 = smov 0  }
   0xb   :  { %s2184_s26 = smov 0   ;;  %s2186_s27 = smov 0  }
   0xc LB: > { %2728 = sst [smem:[#allocation16_spill]] %s2119_s26  ;;  %s2201_s28 = sadd.s32 4294967295, %s2123_s27   ;;  %s2123_s27 = sphi %s2186_s27, %s2749_s27   ;;  %s2119_s26 = sphi %s2184_s26, %s2751_s26   ;;  %s2115_s25 = sphi %s2182_s25, %s2753_s25   ;;  %s2111_s24 = sphi %s2180_s24, %s2752_s24  }
   0xd   : > { %s1672_s29 = sadd.s32 4294967294, %s2123_s27   ;;  %p50_p0 = scmp.ne.s32.totalorder %s2115_s25, %s2111_s24 }
   0xe   : > { %p2718_p1 = scmp.eq.s32.totalorder %s2201_s28, 0  ;;  %p190_p3 = scmp.eq.s32.totalorder %s1672_s29, 1 }
   0xf   : > { %p1673_p5 = scmp.ge.s32.totalorder %s2123_s27, 1  ;;  %p223_p7 = scmp.lt.s32.totalorder %s2123_s27, 3 }
  0x10   : > { %p2210_p4 = por %p2718_p1, %p50_p0  ;;  %p2215_p6 = por %p190_p3, %p50_p0 }
  0x11   : > { %p2220_p8 = pnand %p1673_p5, %p223_p7  ;;  %s2125_s10 = smov [#allocation7]  }
  0x12   : > { %s2729_s30 = scalar_select %p2210_p4, 1, 0 }
  0x13   : > { %s2730_s8 = scalar_select %p2215_p6, 1, 0 }
  0x14   : > { %s2731_s9 = scalar_select %p2220_p8, 1, 0 }
  0x15   : > { %s235_s11 = sshll.u32 %s2125_s10, 4  ;;  %p1830_p9 = pneg %p2220_p8  ;;  %s2224_s11 = int_to_ptr.vmem [resolvable:$true] %s235_s11 }
  0x16   : > { %s2236_s13 = sadd.s32 1, %s2123_s27   ;;  %s37_s14 = sadd.s32 1, %s2119_s26 }
  0x17   : > { %p2231_p11 = pnand %p1830_p9, %p2718_p1  ;;  %2733 = sst [smem:[#allocation17_spill]] %s2236_s13 }
  0x18   : > { %s34_s15 = ssub.s32 %s2123_s27, %s2236_s13  ;;  %s2734_s2 = sld [smem:[#allocation20_spill]] }
  0x19   : > { %p1931_p13 = pneg %p2231_p11 }
  0x1e   : > { %s1929_s18 = scalar_lea.hbm %s2734_s2, 512 }
  0x1f   : > { %p1930_p12 = scmp.ne.s32.totalorder %s2734_s2, %s1929_s18  ;;  %p1936_p5 = scmp.lt.u32.totalorder %s1929_s18, %s2734_s2 }
  0x21   : > { %p1932_p0 = pnand %p1931_p13, %p1930_p12 }
  0x23   : > { %p1933_p3 = pneg %p1932_p0 }
  0x25   : > { %p1938_p7 = pnand %p1936_p5, %p1933_p3 }
  0x27   : > { %1941 = shalt.err (!%p1938_p7)
}
  0x28   : > { %s1942_s23 = scalar_lea.vmem %s2224_s11, 512  ;;  %p1950_p2 = scmp.lt.s32.totalorder %s2224_s11, %s2224_s11 }
  0x29   : > { %p1943_p9 = scmp.ne.s32.totalorder %s2224_s11, %s1942_s23  ;;  %p1951_p6 = scmp.lt.s32.totalorder %s1942_s23, %s1942_s23 }
  0x2b   : > { %p1945_p10 = pnand %p1943_p9, %p1931_p13  ;;  %p1952_p4 = por %p1951_p6, %p1950_p2 }
  0x2d   : > { %p1946_p1 = pneg %p1945_p10 }
  0x2f   : > { %p1953_p8 = pnand %p1952_p4, %p1946_p1 }
  0x31   : > { %1956 = shalt.err (!%p1953_p8)
}
  0x32   : > { %s2721_s29 = smov 128   ;;  %s2722_s10 = smov 8  }
  0x33   : > { %1833 = dma.hbm_to_vmem [thread:$0]  (!%p2231_p11), %s2734_s2, 512, %s2224_s11, [#allocation6], %s2721_s29, %s2721_s29, %s2722_s10  }
  0x34   : > { %p35_p1 = scmp.eq.s32.totalorder %s34_s15, 0  ;;  %p44_p2 = scmp.ne.s32.totalorder %s2119_s26, %s2115_s25 }
  0x35   : > { %p45_p4 = scmp.eq.s32.totalorder %s2123_s27, 0  ;;  %p1849_p6 = scmp.lt.s32.totalorder %s2123_s27, 2 }
  0x36   : > { %s2270_s18 = scalar_select %p35_p1, %s2119_s26, %s37_s14  }
  0x37   : > { %p46_p8 = por %p45_p4, %p44_p2  ;;  %p2736_p10 = scmp.eq.s32.totalorder %s2201_s28, 1 }
  0x38   : > { %2735 = sst [smem:[#allocation18_spill]] %s2270_s18  ;;  %s2279_s12 = sand.u32 1, %s2119_s26  }
  0x39   : > { %p2274_p12 = por %p2736_p10, %p44_p2  ;;  %s1713_s20 = sshll.u32 %s2123_s27, 11 }
  0x3a   : > { %s1676_s21 = sshll.u32 %s2279_s12, 7  ;;  %s2738_s0 = sld [smem:[#allocation19_spill]] }
  0x3b   : > { %s262_s14 = scalar_lea.vmem [#allocation2], %s1676_s21  ;;  %p2288_p11 = pnand %p1849_p6, %p46_p8 }
  0x3c   : > { %s270_s23 = sshll.u32 %s262_s14, 4  ;;  %s259_s29 = scalar_lea.sflag [#allocation3], %s2279_s12  ;;  %s2292_s23 = int_to_ptr.vmem [resolvable:$true] %s270_s23 }
  0x3d   : > { %p1959_p0 = pneg %p2288_p11 }
  0x40   : > { %s2286_s15 = scalar_lea.hbm %s2738_s0, %s1713_s20  ;;  %s1962_s11 = scalar_lea.hbm %s2738_s0, 4096 }
  0x41   : > { %s1957_s10 = scalar_lea.hbm %s2286_s15, 2048  ;;  %p1963_p7 = scmp.lt.u32.totalorder %s2286_s15, %s2738_s0 }
  0x42   : > { %p1958_p13 = scmp.ne.s32.totalorder %s2286_s15, %s1957_s10  ;;  %p1964_p9 = scmp.lt.u32.totalorder %s1962_s11, %s1957_s10 }
  0x43   : > { %p1966_p2 = scmp.lt.u32.totalorder %s1957_s10, %s2286_s15 }
  0x44   : > { %p1960_p3 = pnand %p1959_p0, %p1958_p13  ;;  %p1965_p1 = por %p1964_p9, %p1963_p7 }
  0x46   : > { %p1961_p5 = pneg %p1960_p3  ;;  %p1967_p4 = por %p1966_p2, %p1965_p1 }
  0x48   : > { %p1968_p6 = pnand %p1967_p4, %p1961_p5 }
  0x4a   : > { %1971 = shalt.err (!%p1968_p6)
}
  0x4b   : > { %s1972_s17 = scalar_lea.vmem %s2292_s23, 2048  ;;  %s2128_s20 = smov [#allocation2]  }
  0x4c   : > { %p1973_p8 = scmp.ne.s32.totalorder %s2292_s23, %s1972_s17  ;;  %s1977_s21 = sshll.u32 %s2128_s20, 4  ;;  %s1978_s21 = int_to_ptr.vmem [resolvable:$false] %s1977_s21 }
  0x4d   : > { %s1979_s22 = scalar_lea.vmem %s1978_s21, 4096  ;;  %p1980_p3 = scmp.lt.s32.totalorder %s2292_s23, %s1978_s21 }
  0x4e   : > { %p1975_p10 = pnand %p1973_p8, %p1959_p0  ;;  %p1981_p7 = scmp.lt.s32.totalorder %s1979_s22, %s1972_s17 }
  0x50   : > { %p1976_p13 = pneg %p1975_p10  ;;  %p1982_p9 = por %p1981_p7, %p1980_p3 }
  0x52   : > { %p1983_p1 = pnand %p1982_p9, %p1976_p13 }
  0x54   : > { %1986 = shalt.err (!%p1983_p1)
}
  0x55   : > { %s2740_s10 = smov 8   ;;  %s2741_s11 = smov 128  }
  0x56   : > { %1837 = dma.hbm_to_vmem [thread:$0]  (!%p2288_p11), %s2286_s15, 2048, %s2292_s23, %s259_s29, %s2741_s11, %s2741_s11, %s2740_s10  }
  0x57   : > { %s1680_s14 = sshll.u32 %s2279_s12, 3  ;;  %s1714_s20 = sshll.u32 %s2123_s27, 7 }
  0x58   : > { %s2331_s22 = scalar_lea.hbm %s2711_s1, %s1714_s20  ;;  %s284_s0 = scalar_lea.vmem [#allocation5], %s1680_s14 }
  0x59   : > { %s291_s2 = sshll.u32 %s284_s0, 4  ;;  %s2742_s18 = sand.u32 1, %s2123_s27   ;;  %s2333_s2 = int_to_ptr.vmem [resolvable:$true] %s291_s2 }
  0x5a   : > { %s2337_s26 = scalar_lea.sflag [#allocation6], %s2742_s18  ;;  %s1987_s13 = scalar_lea.hbm %s2331_s22, 128 }
  0x5b   : > { %p1988_p5 = scmp.ne.s32.totalorder %s2331_s22, %s1987_s13  ;;  %s1992_s15 = scalar_lea.hbm %s2711_s1, 256 }
  0x5c   : > { %p1993_p6 = scmp.lt.u32.totalorder %s2331_s22, %s2711_s1  ;;  %p1994_p8 = scmp.lt.u32.totalorder %s1992_s15, %s1987_s13 }
  0x5d   : > { %p1990_p2 = pnand %p1988_p5, %p1959_p0  ;;  %p1996_p13 = scmp.lt.u32.totalorder %s1987_s13, %s2331_s22 }
  0x5e   : > { %p1995_p10 = por %p1994_p8, %p1993_p6 }
  0x5f   : > { %p1991_p4 = pneg %p1990_p2 }
  0x60   : > { %p1997_p3 = por %p1996_p13, %p1995_p10 }
  0x62   : > { %p1998_p7 = pnand %p1997_p3, %p1991_p4 }
  0x64   : > { %2001 = shalt.err (!%p1998_p7)
}
  0x65   : > { %s2002_s0 = scalar_lea.vmem %s2333_s2, 128  ;;  %s2129_s18 = smov [#allocation5]  }
  0x66   : > { %p2003_p9 = scmp.ne.s32.totalorder %s2333_s2, %s2002_s0  ;;  %s2007_s11 = sshll.u32 %s2129_s18, 4  ;;  %s2008_s11 = int_to_ptr.vmem [resolvable:$false] %s2007_s11 }
  0x67   : > { %s2009_s14 = scalar_lea.vmem %s2008_s11, 256  ;;  %p2010_p2 = scmp.lt.s32.totalorder %s2333_s2, %s2008_s11 }
  0x68   : > { %p2005_p1 = pnand %p2003_p9, %p1959_p0  ;;  %p2011_p6 = scmp.lt.s32.totalorder %s2009_s14, %s2002_s0 }
  0x6a   : > { %p2006_p5 = pneg %p2005_p1  ;;  %p2012_p8 = por %p2011_p6, %p2010_p2 }
  0x6c   : > { %p2013_p10 = pnand %p2012_p8, %p2006_p5 }
  0x6e   : > { %2016 = shalt.err (!%p2013_p10)
}
  0x6f   : > { %s2130_s13 = smov 16   ;;  %s2131_s20 = smov 1  }
  0x70   : > { %1840 = dma.hbm_to_vmem [thread:$0]  (!%p2288_p11), %s2331_s22, 128, %s2333_s2, %s2337_s26, %s2130_s13, %s2130_s13, %s2131_s20  }
  0x71   : > { %p2743_p0 = scmp.ne.s32.totalorder %s2731_s9, 0 }
  0x72   : > { %s2366_s17 = sand.u32 (!%p2743_p0), 1, %s2115_s25   ;;  %p2744_p4 = scmp.ne.s32.totalorder (!%p2743_p0), %s2729_s30, 0 }
  0x73   : > { %303 = sbr.rel (%p2743_p0) target bundleno = 1239 (0x4d7), region = 44  ;;  %s1684_s21 = sshll.u32 (!%p2743_p0), %s2366_s17, 7 }
  0x74   : > { %s306_s29 = scalar_lea.sflag (!%p2743_p0), [#allocation3], %s2366_s17  ;;  %s2370_s12 = scalar_lea.vmem (!%p2743_p0), [#allocation2], %s1684_s21 }
  0x7a   : > { %2090 = dma.done.wait (%p2744_p4), %s306_s29, 2048  }
  0x7b   : > { %2092 = vsyncadd (%p2744_p4), %s306_s29, 4294965248  ;;  %s314_s2 = sand.u32 1, %s2201_s28   ;;  %s2378_s26 = sshll.u32 %s2366_s17, 3 }
  0x7c   : > { %s315_s9 = scalar_lea.sflag [#allocation6], %s314_s2  ;;  %s2381_s16 = scalar_lea.vmem [#allocation5], %s2378_s26 }
  0x7d   : > { %2094 = dma.done.wait (%p2744_p4), %s315_s9, 128  }
  0x7e   : > { %2096 = vsyncadd (%p2744_p4), %s315_s9, 4294967168  ;;  %p2745_p11 = scmp.eq.s32.totalorder %s2201_s28, 0 }
  0x80   : > { %2098 = dma.done.wait (%p2745_p11), [#allocation6], 512   ;;  %p2746_p13 = pmov %p2745_p11 }
  0x81   : > { %vm392_vm0 = vcmask 261120   ;;  %v381_v0 = vld [vmem:[#allocation7] sm:$0xff]  ;;  %v382_v1 = vld [vmem:[#allocation7 + $0x8] sm:$0xff]  ;;  %v383_v2 = vld [vmem:[#allocation7 + $0x10] sm:$0xff]  ;;  %v2132_v24 = vmov 0   ;;  %vm1098_vm1 = vcmask 125952  }
  0x82   : > { %2100 = vsyncadd (%p2746_p13), [#allocation6], 4294966784  ;;  %v1810_v3 = vpack.c.bf16 %v382_v1, %v381_v0  ;;  %v384_v4 = vld [vmem:[#allocation7 + $0x18] sm:$0xff]  ;;  %v2392_v5 = vld [vmem:[%s2370_s12] sm:$0xff]  ;;  %1896 = vset.pattern.permute.xlu0 %v2132_v24  ;;  %s2135_s18 = smov 32   ;;  %s2136_s11 = smov 16  }
  0x83   : > { %v1814_v6 = vpack.c.bf16 %v384_v4, %v383_v2  ;;  %1760 = vmatprep.mubr.msk.f32.mxu0 %vm392_vm0, %v2392_v5  ;;  %v2397_v7 = vld [vmem:[%s2370_s12 + $0x8] sm:$0xff]  ;;  %v2400_v8 = vld [vmem:[%s2370_s12 + $0x10] sm:$0xff]  ;;  %v2407_v9 = vld [vmem:[%s2370_s12 + $0x18] sm:$0xff]  ;;  %s2137_s14 = smov 48   ;;  %vm1267_vm2 = vcmask 130048   ;;  %vm1270_vm3 = vcmask 392192  }
  0x84   : > { %1811 = vmatprep.subr.bf16.mxu0 %v1810_v3  ;;  %v2410_v10 = vld [vmem:[%s2370_s12 + $0x20] sm:$0xff]  ;;  %v2417_v11 = vld [vmem:[%s2370_s12 + $0x28] sm:$0xff]  ;;  %v2420_v12 = vld [vmem:[%s2370_s12 + $0x30] sm:$0xff]  ;;  %s1708_s13 = sshll.u32 %s2201_s28, 7  ;;  %s362_s20 = scalar_lea.vmem [#allocation9], %s2378_s26  ;;  %vm1272_vm4 = vcmask 523264  }
  0x85   : > { %1813 = vmatpush3.bf16.msra.mxu0 %v1810_v3  ;;  %v2427_v13 = vld [vmem:[%s2370_s12 + $0x38] sm:$0xff]  ;;  %v2430_v14 = vld [vmem:[%s2370_s12 + $0x40] sm:$0xff]  ;;  %v2437_v15 = vld [vmem:[%s2370_s12 + $0x48] sm:$0xff]  ;;  %s1538_s21 = sshll.u32 %s362_s20, 4  ;;  %s2627_s2 = scalar_lea.hbm %s2717_s7, %s1708_s13  ;;  %vm1490_vm5 = vcmask 1041409   ;;  %vm1492_vm6 = vcmask 1042434   ;;  %s2629_s21 = int_to_ptr.vmem [resolvable:$true] %s1538_s21 }
  0x86   : > { %1815 = vmatprep.subr.bf16.mxu0 %v1814_v6  ;;  %v2440_v16 = vld [vmem:[%s2370_s12 + $0x50] sm:$0xff]  ;;  %v2447_v17 = vld [vmem:[%s2370_s12 + $0x58] sm:$0xff]  ;;  %v2450_v18 = vld [vmem:[%s2370_s12 + $0x60] sm:$0xff]  ;;  %vm1494_vm7 = vcmask 1043459   ;;  %s1512_s9 = scalar_lea.sflag [#allocation10], %s2366_s17  ;;  %s2138_s30 = smov [#allocation9]  }
  0x87   : > { %v2457_v19 = vld [vmem:[%s2370_s12 + $0x68] sm:$0xff]  ;;  %v2460_v20 = vld [vmem:[%s2370_s12 + $0x70] sm:$0xff]  ;;  %v2467_v21 = vld [vmem:[%s2370_s12 + $0x78] sm:$0xff]  ;;  %s2021_s22 = sshll.u32 %s2138_s30, 4  ;;  %s2022_s22 = int_to_ptr.vmem [resolvable:$false] %s2021_s22 }
  0x88   : > { %v602_v22 = vld [vmem:[%s2714_s4] sm:$0xf]  ;;  %s2023_s15 = scalar_lea.vmem %s2022_s22, 256  ;;  %p2024_p1 = scmp.lt.s32.totalorder %s2629_s21, %s2022_s22 }
  0x89   : > { %1817 = vmatpush3.bf16.msra.mxu0 %v1814_v6  ;;  %1784 = vmatprep.subr.mxu1 %v602_v22  ;;  %v1004_v23 = vld [vmem:[%s2715_s5] sm:$0xf] }
  0x8a   : > { %1785 = vmatpush3.xpose.msra.mxu1 %v602_v22  ;;  %1007 = vperm.xlu0 %1896, %v1004_v23   ;;  %v1689_v25 = vld [vmem:[%s2713_s3] ss:$0 sm:$0xff] }
  0x8c   : > { %1761 = vmatmul.mubr.msk.f32.vlgmr.msra.gmra.mrb[0].mxu0 %vm392_vm0, %v2397_v7 }
  0x8d   : > { %1763 = vmatprep.mubr.msk.f32.mxu0 %vm392_vm0, %v2400_v8 }
  0x90   : > { %1764 = vmatmul.mubr.msk.f32.gmra.mrb[2].mxu0 %vm392_vm0, %v2407_v9 }
  0x91   : > { %1766 = vmatprep.mubr.msk.f32.mxu0 %vm392_vm0, %v2410_v10 }
  0x94   : > { %1767 = vmatmul.mubr.msk.f32.gmra.mrb[4].mxu0 %vm392_vm0, %v2417_v11 }
  0x95   : > { %1769 = vmatprep.mubr.msk.f32.mxu0 %vm392_vm0, %v2420_v12 }
  0x98   : > { %1770 = vmatmul.mubr.msk.f32.gmra.mrb[6].mxu0 %vm392_vm0, %v2427_v13 }
  0x99   : > { %1772 = vmatprep.mubr.msk.f32.mxu0 %vm392_vm0, %v2430_v14 }
  0x9c   : > { %1773 = vmatmul.mubr.msk.f32.gmra.mrb[8].mxu0 %vm392_vm0, %v2437_v15 }
  0x9d   : > { %1775 = vmatprep.mubr.msk.f32.mxu0 %vm392_vm0, %v2440_v16 }
  0xa0   : > { %1776 = vmatmul.mubr.msk.f32.gmra.mrb[10].mxu0 %vm392_vm0, %v2447_v17 }
  0xa1   : > { %1778 = vmatprep.mubr.msk.f32.mxu0 %vm392_vm0, %v2450_v18 }
  0xa4   : > { %1779 = vmatmul.mubr.msk.f32.gmra.mrb[12].mxu0 %vm392_vm0, %v2457_v19 }
  0xa5   : > { %1781 = vmatprep.mubr.msk.f32.mxu0 %vm392_vm0, %v2460_v20 }
  0xa8   : > { %1782 = vmatmul.mubr.msk.f32.gmra.mrb[14].mxu0 %vm392_vm0, %v2467_v21 }
 0x15f   : > { %v1762_v26 = vpop.f32.mrb[0].mxu0 }
 0x160   : > { %v513_v27 = vadd.f32 %v1762_v26, %v1689_v25  ;;  %v507_v28 = vpop.f32.mrb[1].mxu0 }
 0x161   : > { %v508_v29 = vadd.f32 %v1689_v25, %v507_v28 }
 0x162   : > { %v587_v32 = vmax.f32 %v513_v27, 0.0 }
 0x163   : > { %v1765_v30 = vpop.f32.mrb[2].mxu0  ;;  %v586_v31 = vmax.f32 %v508_v29, 0.0 }
 0x164   : > { %v523_v33 = vadd.f32 %v1765_v30, %v1689_v25  ;;  %v517_v34 = vpop.f32.mrb[3].mxu0 }
 0x165   : > { %v518_v35 = vadd.f32 %v1689_v25, %v517_v34  ;;  %1786 = vmatprep.mubr.f32.mxu1 %v586_v31 }
 0x166   : > { %1787 = vmatmul.mubr.f32.vlgmr.msra.gmra.mrb[0].mxu1 %v587_v32  ;;  %v589_v38 = vmax.f32 %v523_v33, 0.0 }
 0x167   : > { %v588_v36 = vmax.f32 %v518_v35, 0.0  ;;  %v1768_v37 = vpop.f32.mrb[4].mxu0 }
 0x168   : > { %v533_v39 = vadd.f32 %v1768_v37, %v1689_v25  ;;  %v527_v40 = vpop.f32.mrb[5].mxu0 }
 0x169   : > { %v528_v41 = vadd.f32 %v1689_v25, %v527_v40  ;;  %1789 = vmatprep.mubr.f32.mxu1 %v588_v36 }
 0x16a   : > { %v591_v42 = vmax.f32 %v533_v39, 0.0  ;;  %1790 = vmatmul.mubr.f32.gmra.mrb[2].mxu1 %v589_v38 }
 0x16b   : > { %v590_v43 = vmax.f32 %v528_v41, 0.0  ;;  %v1771_v44 = vpop.f32.mrb[6].mxu0 }
 0x16c   : > { %v543_v45 = vadd.f32 %v1771_v44, %v1689_v25  ;;  %v537_v46 = vpop.f32.mrb[7].mxu0 }
 0x16d   : > { %v538_v47 = vadd.f32 %v1689_v25, %v537_v46  ;;  %1792 = vmatprep.mubr.f32.mxu1 %v590_v43  ;;  %v1018_v43 = vld [vmem:[%s2381_s16] sm:$0x1]  ;;  %v1019_v46 = vld [vmem:[%s2381_s16 + $0x1] sm:$0x1] }
 0x16e   : > { %v593_v48 = vmax.f32 %v543_v45, 0.0  ;;  %1793 = vmatmul.mubr.f32.gmra.mrb[4].mxu1 %v591_v42  ;;  %v1050_v42 = vlaneseq  ;;  %v1026_v44 = vsub.f32 1.0, %v1018_v43 }
 0x16f   : > { %v592_v49 = vmax.f32 %v538_v47, 0.0  ;;  %v1774_v50 = vpop.f32.mrb[8].mxu0 }
 0x170   : > { %v553_v51 = vadd.f32 %v1774_v50, %v1689_v25  ;;  %v547_v52 = vpop.f32.mrb[9].mxu0  ;;  %v2481_v45 = vshrl.u32 %v1050_v42, 7  ;;  %v1034_v47 = vmul.f32 -9999.0, %v1026_v44  ;;  %v2487_v50 = vpop.permute.xlu0 %1007 }
 0x171   : > { %v548_v53 = vadd.f32 %v1689_v25, %v547_v52  ;;  %1795 = vmatprep.mubr.f32.mxu1 %v592_v49  ;;  %v1027_v49 = vsub.f32 1.0, %v1019_v46 }
 0x172   : > { %v595_v54 = vmax.f32 %v553_v51, 0.0  ;;  %1796 = vmatmul.mubr.f32.gmra.mrb[6].mxu1 %v593_v48  ;;  %v2485_v48 = vsub.s32 0, %v2481_v45 }
 0x173   : > { %v594_v55 = vmax.f32 %v548_v53, 0.0  ;;  %v1777_v56 = vpop.f32.mrb[10].mxu0  ;;  %v1035_v52 = vmul.f32 -9999.0, %v1027_v49 }
 0x174   : > { %v563_v57 = vadd.f32 %v1777_v56, %v1689_v25  ;;  %v557_v58 = vpop.f32.mrb[11].mxu0  ;;  %v1053_v51 = vrot.slane %v1034_v47, %v2485_v48  ;;  %v1025_v47 = vld [vmem:[%s2381_s16 + $0x7] sm:$0x1] }
 0x175   : > { %v558_v59 = vadd.f32 %v1689_v25, %v557_v58  ;;  %1798 = vmatprep.mubr.f32.mxu1 %v594_v55 }
 0x176   : > { %v597_v60 = vmax.f32 %v563_v57, 0.0  ;;  %1799 = vmatmul.mubr.f32.gmra.mrb[8].mxu1 %v595_v54  ;;  %v1020_v54 = vld [vmem:[%s2381_s16 + $0x2] sm:$0x1]  ;;  %v1057_v57 = vrot.slane %v1035_v52, %v2485_v48 }
 0x177   : > { %v596_v61 = vmax.f32 %v558_v59, 0.0  ;;  %v1780_v62 = vpop.f32.mrb[12].mxu0  ;;  %v1028_v58 = vsub.f32 1.0, %v1020_v54 }
 0x178   : > { %v573_v63 = vadd.f32 %v1780_v62, %v1689_v25  ;;  %v567_v0 = vpop.f32.mrb[13].mxu0 }
 0x179   : > { %v568_v1 = vadd.f32 %v1689_v25, %v567_v0  ;;  %1801 = vmatprep.mubr.f32.mxu1 %v596_v61  ;;  %v1021_v0 = vld [vmem:[%s2381_s16 + $0x3] sm:$0x1] }
 0x17a   : > { %v599_v2 = vmax.f32 %v573_v63, 0.0  ;;  %1802 = vmatmul.mubr.f32.gmra.mrb[10].mxu1 %v597_v60  ;;  %v1036_v63 = vmul.f32 -9999.0, %v1028_v58 }
 0x17b   : > { %v598_v3 = vmax.f32 %v568_v1, 0.0  ;;  %v1783_v4 = vpop.f32.mrb[14].mxu0 }
 0x17c   : > { %v583_v6 = vadd.f32 %v1783_v4, %v1689_v25  ;;  %v577_v22 = vpop.f32.mrb[15].mxu0 }
 0x17d   : > { %1804 = vmatprep.mubr.f32.mxu1 %v598_v3  ;;  %v578_v23 = vadd.f32 %v1689_v25, %v577_v22  ;;  %v1029_v3 = vsub.f32 1.0, %v1021_v0 }
 0x17e   : > { %1805 = vmatmul.mubr.f32.gmra.mrb[12].mxu1 %v599_v2  ;;  %v601_v24 = vmax.f32 %v583_v6, 0.0  ;;  %v1061_v2 = vrot.slane %v1036_v63, %v2485_v48 }
 0x17f   : > { %v600_v26 = vmax.f32 %v578_v23, 0.0  ;;  %v1037_v23 = vmul.f32 -9999.0, %v1029_v3 }
 0x181   : > { %1807 = vmatprep.mubr.f32.mxu1 %v600_v26 }
 0x182   : > { %1808 = vmatmul.mubr.f32.gmra.mrb[14].mxu1 %v601_v24  ;;  %v1022_v24 = vld [vmem:[%s2381_s16 + $0x4] sm:$0x1] }
 0x239   : > { %v1788_v27 = vpop.f32.mrb[0].mxu1 }
 0x23a   : > { %v669_v28 = vpop.f32.mrb[1].mxu1 }
 0x23b   : > { %748 = vxpose.xlu0.b32.start [1/2] (short) (narrow) %v669_v28, 8  ;;  %v1065_v28 = vrot.slane %v1037_v23, %v2485_v48 }
 0x23d   : > { %v1791_v29 = vpop.f32.mrb[2].mxu1 }
 0x23e   : > { %v679_v30 = vpop.f32.mrb[3].mxu1 }
 0x23f   : > { %749 = vxpose.xlu0.b32.end [2/2] (short) (narrow) %v1788_v27, 8  ;;  %780 = vxpose.xlu1.b32.start [1/2] (short) (narrow) %v679_v30, 8  ;;  %v1024_v27 = vld [vmem:[%s2381_s16 + $0x6] sm:$0x1] }
 0x241   : > { %v1794_v31 = vpop.f32.mrb[4].mxu1 }
 0x242   : > { %v689_v32 = vpop.f32.mrb[5].mxu1 }
 0x243   : > { %781 = vxpose.xlu1.b32.end [2/2] (short) (narrow) %v1791_v29, 8  ;;  %v1030_v29 = vsub.f32 1.0, %v1022_v24 }
 0x245   : > { %v1797_v33 = vpop.f32.mrb[6].mxu1 }
 0x246   : > { %v699_v34 = vpop.f32.mrb[7].mxu1 }
 0x247   : > { %812 = vxpose.xlu1.b32.start [1/2] (short) (narrow) %v689_v32, 8  ;;  %v1032_v32 = vsub.f32 1.0, %v1024_v27 }
 0x249   : > { %v1800_v35 = vpop.f32.mrb[8].mxu1 }
 0x24a   : > { %v709_v25 = vpop.f32.mrb[9].mxu1 }
 0x24b   : > { %813 = vxpose.xlu1.b32.end [2/2] (short) (narrow) %v1794_v31, 8 }
 0x24d   : > { %v1803_v36 = vpop.f32.mrb[10].mxu1 }
 0x24e   : > { %v719_v37 = vpop.f32.mrb[11].mxu1 }
 0x24f   : > { %844 = vxpose.xlu1.b32.start [1/2] (short) (narrow) %v699_v34, 8  ;;  %v1038_v34 = vmul.f32 -9999.0, %v1030_v29 }
 0x251   : > { %v1806_v38 = vpop.f32.mrb[12].mxu1 }
 0x252   : > { %v729_v39 = vpop.f32.mrb[13].mxu1 }
 0x253   : > { %845 = vxpose.xlu1.b32.end [2/2] (short) (narrow) %v1797_v33, 8  ;;  %940 = vxpose.xlu0.b32.start [1/2] (short) (narrow) %v729_v39, 8 }
 0x255   : > { %v1809_v40 = vpop.f32.mrb[14].mxu1 }
 0x256   : > { %v739_v41 = vpop.f32.mrb[15].mxu1 }
 0x257   : > { %876 = vxpose.xlu1.b32.start [1/2] (short) (narrow) %v709_v25, 8  ;;  %941 = vxpose.xlu0.b32.end [2/2] (short) (narrow) %v1806_v38, 8  ;;  %v1069_v38 = vrot.slane %v1038_v34, %v2485_v48 }
 0x25b   : > { %877 = vxpose.xlu1.b32.end [2/2] (short) (narrow) %v1800_v35, 8  ;;  %v1023_v35 = vld [vmem:[%s2381_s16 + $0x5] sm:$0x1]  ;;  %s2017_s16 = scalar_lea.vmem %s2629_s21, 128 }
 0x25c   : > { %v1031_v39 = vsub.f32 1.0, %v1023_v35  ;;  %p2018_p3 = scmp.ne.s32.totalorder %s2629_s21, %s2017_s16  ;;  %p2025_p5 = scmp.lt.s32.totalorder %s2023_s15, %s2017_s16 }
 0x25e   : > { %v1039_v46 = vmul.f32 -9999.0, %v1031_v39  ;;  %p2019_p7 = pnand %p2018_p3, %p2274_p12  ;;  %p2026_p2 = por %p2025_p5, %p2024_p1 }
 0x25f   : > { %908 = vxpose.xlu1.b32.start [1/2] (short) (narrow) %v719_v37, 8 }
 0x260   : > { %v1073_v52 = vrot.slane %v1039_v46, %v2485_v48  ;;  %p2020_p9 = pneg %p2019_p7 }
 0x262   : > { %p2027_p6 = pnand %p2026_p2, %p2020_p9 }
 0x263   : > { %909 = vxpose.xlu1.b32.end [2/2] (short) (narrow) %v1803_v36, 8  ;;  %v1040_v36 = vmul.f32 -9999.0, %v1032_v32 }
 0x265   : > { %v1077_v43 = vrot.slane %v1040_v36, %v2485_v48 }
 0x267   : > { %972 = vxpose.xlu1.b32.start [1/2] (short) (narrow) %v739_v41, 8 }
 0x26b   : > { %973 = vxpose.xlu1.b32.end [2/2] (short) (narrow) %v1809_v40, 8 }
 0x2bb   : > { %v764_v53 = vpop.trf.xlu0 }
 0x2bc   : > { %v1010_v55 = vadd.f32 %v2487_v50, %v764_v53  ;;  %v1033_v53 = vsub.f32 1.0, %v1025_v47 }
 0x2be   : > { %v2492_v56 = vadd.f32 %v1053_v51, %v1010_v55 }
 0x2bf   : > { %v796_v59 = vpop.trf.xlu1 }
 0x2c0   : > { %v1011_v60 = vadd.f32 %v2487_v50, %v796_v59  ;;  %v1099_v61 = vsel %vm1098_vm1, %v2492_v56, -inf  ;;  %v1041_v59 = vmul.f32 -9999.0, %v1033_v53 }
 0x2c1   : > { %1100 = vmax.xlane.f32.xlu0 %v1099_v61 }
 0x2c2   : > { %v1091_v62 = vadd.f32 %v1057_v57, %v1011_v60  ;;  %v1081_v61 = vrot.slane %v1041_v59, %v2485_v48 }
 0x2c4   : > { %v1102_v1 = vsel %vm1098_vm1, %v1091_v62, -inf }
 0x2c5   : > { %1103 = vmax.xlane.f32.xlu1 %v1102_v1 }
 0x2c7   : > { %v828_v4 = vpop.trf.xlu1 }
 0x2c8   : > { %v1012_v6 = vadd.f32 %v2487_v50, %v828_v4 }
 0x2ca   : > { %v1092_v22 = vadd.f32 %v1061_v2, %v1012_v6 }
 0x2cc   : > { %v1105_v26 = vsel %vm1098_vm1, %v1092_v22, -inf }
 0x2cd   : > { %1106 = vmax.xlane.f32.xlu1 %v1105_v26 }
 0x2cf   : > { %v860_v30 = vpop.trf.xlu1 }
 0x2d0   : > { %v1013_v31 = vadd.f32 %v2487_v50, %v860_v30 }
 0x2d2   : > { %v1093_v33 = vadd.f32 %v1065_v28, %v1013_v31 }
 0x2d3   : > { %v956_v37 = vpop.trf.xlu0 }
 0x2d4   : > { %v1108_v25 = vsel %vm1098_vm1, %v1093_v33, -inf  ;;  %v1016_v41 = vadd.f32 %v2487_v50, %v956_v37 }
 0x2d5   : > { %1109 = vmax.xlane.f32.xlu0 %v1108_v25 }
 0x2d6   : > { %v1096_v51 = vadd.f32 %v1077_v43, %v1016_v41 }
 0x2d7   : > { %v892_v40 = vpop.trf.xlu1 }
 0x2d8   : > { %v1014_v42 = vadd.f32 %v2487_v50, %v892_v40  ;;  %v1117_v57 = vsel %vm1098_vm1, %v1096_v51, -inf }
 0x2da   : > { %v1094_v44 = vadd.f32 %v1069_v38, %v1014_v42 }
 0x2dc   : > { %v1111_v49 = vsel %vm1098_vm1, %v1094_v44, -inf }
 0x2dd   : > { %1112 = vmax.xlane.f32.xlu1 %v1111_v49 }
 0x2df   : > { %v924_v54 = vpop.trf.xlu1 }
 0x2e0   : > { %v1015_v55 = vadd.f32 %v2487_v50, %v924_v54 }
 0x2e1   : > { %1118 = vmax.xlane.f32.xlu1 %v1117_v57 }
 0x2e2   : > { %v1095_v58 = vadd.f32 %v1073_v52, %v1015_v55 }
 0x2e4   : > { %v1114_v60 = vsel %vm1098_vm1, %v1095_v58, -inf }
 0x2e5   : > { %1115 = vmax.xlane.f32.xlu0 %v1114_v60 }
 0x2e7   : > { %v988_v63 = vpop.trf.xlu1 }
 0x2e8   : > { %v1017_v0 = vadd.f32 %v2487_v50, %v988_v63 }
 0x2ea   : > { %v1097_v1 = vadd.f32 %v1081_v61, %v1017_v0 }
 0x2ec   : > { %v1120_v2 = vsel %vm1098_vm1, %v1097_v1, -inf }
 0x2ed   : > { %1121 = vmax.xlane.f32.xlu0 %v1120_v2 }
 0x34e   : > { %v1101_v3 = vpop.xlane.xlu0 %1100 }
 0x34f   : > { %v1123_v4 = vsub.f32 %v2492_v56, %v1101_v3 }
 0x351   : > { %v1131_v6 = vmul.f32 1.442695, %v1123_v4 }
 0x352   : > { %v1104_v23 = vpop.xlane.xlu1 %1103 }
 0x353   : > { %1897 = vpow2.f32 %v1131_v6  ;;  %v1124_v24 = vsub.f32 %v1091_v62, %v1104_v23 }
 0x355   : > { %v1133_v26 = vmul.f32 1.442695, %v1124_v24 }
 0x357   : > { %1899 = vpow2.f32 %v1133_v26 }
 0x35a   : > { %v1107_v27 = vpop.xlane.xlu1 %1106 }
 0x35b   : > { %v1125_v28 = vsub.f32 %v1092_v22, %v1107_v27 }
 0x35d   : > { %v1898_v29 = vpop.eup %1897  ;;  %v1135_v48 = vmul.f32 1.442695, %v1125_v28 }
 0x35e   : > { %v1147_v30 = vsel %vm1098_vm1, %v1898_v29, 0.0 }
 0x35f   : > { %1901 = vpow2.f32 %v1135_v48  ;;  %1148 = vadd.xlane.f32.xlu1 %v1147_v30 }
 0x361   : > { %v1900_v50 = vpop.eup %1899 }
 0x362   : > { %v1110_v31 = vpop.xlane.xlu0 %1109  ;;  %v1150_v32 = vsel %vm1098_vm1, %v1900_v50, 0.0 }
 0x363   : > { %v1126_v34 = vsub.f32 %v1093_v33, %v1110_v31  ;;  %1151 = vadd.xlane.f32.xlu0 %v1150_v32 }
 0x365   : > { %v1137_v56 = vmul.f32 1.442695, %v1126_v34 }
 0x367   : > { %1903 = vpow2.f32 %v1137_v56 }
 0x369   : > { %v1902_v35 = vpop.eup %1901 }
 0x36a   : > { %v1113_v62 = vpop.xlane.xlu1 %1112  ;;  %v1153_v25 = vsel %vm1098_vm1, %v1902_v35, 0.0 }
 0x36b   : > { %v1127_v36 = vsub.f32 %v1094_v44, %v1113_v62  ;;  %1154 = vadd.xlane.f32.xlu1 %v1153_v25 }
 0x36d   : > { %v1139_v22 = vmul.f32 1.442695, %v1127_v36 }
 0x36e   : > { %v1119_v37 = vpop.xlane.xlu1 %1118 }
 0x36f   : > { %1905 = vpow2.f32 %v1139_v22  ;;  %v1129_v38 = vsub.f32 %v1096_v51, %v1119_v37 }
 0x371   : > { %v2526_v39 = vpop.eup %1903  ;;  %v1143_v40 = vmul.f32 1.442695, %v1129_v38 }
 0x372   : > { %v1116_v41 = vpop.xlane.xlu0 %1115  ;;  %v1156_v33 = vsel %vm1098_vm1, %v2526_v39, 0.0 }
 0x373   : > { %1907 = vpow2.f32 %v1143_v40  ;;  %v1128_v42 = vsub.f32 %v1095_v58, %v1116_v41  ;;  %1157 = vadd.xlane.f32.xlu0 %v1156_v33 }
 0x375   : > { %v1141_v43 = vmul.f32 1.442695, %v1128_v42 }
 0x377   : > { %1909 = vpow2.f32 %v1141_v43 }
 0x379   : > { %v2530_v46 = vpop.eup %1905 }
 0x37a   : > { %v1122_v44 = vpop.xlane.xlu0 %1121  ;;  %v1159_v47 = vsel %vm1098_vm1, %v2530_v46, 0.0 }
 0x37b   : > { %v1130_v49 = vsub.f32 %v1097_v1, %v1122_v44  ;;  %1160 = vadd.xlane.f32.xlu1 %v1159_v47 }
 0x37d   : > { %v2534_v51 = vpop.eup %1907  ;;  %v1145_v52 = vmul.f32 1.442695, %v1130_v49 }
 0x37e   : > { %v1165_v53 = vsel %vm1098_vm1, %v2534_v51, 0.0 }
 0x37f   : > { %1911 = vpow2.f32 %v1145_v52  ;;  %1166 = vadd.xlane.f32.xlu1 %v1165_v53 }
 0x381   : > { %v2538_v54 = vpop.eup %1909 }
 0x382   : > { %v1162_v55 = vsel %vm1098_vm1, %v2538_v54, 0.0 }
 0x383   : > { %1163 = vadd.xlane.f32.xlu0 %v1162_v55 }
 0x389   : > { %v2542_v57 = vpop.eup %1911 }
 0x38a   : > { %v1168_v58 = vsel %vm1098_vm1, %v2542_v57, 0.0 }
 0x38b   : > { %1169 = vadd.xlane.f32.xlu0 %v1168_v58 }
 0x3ec   : > { %v1149_v59 = vpop.xlane.xlu1 %1148 }
 0x3ed   : > { %1913 = vrcp.f32 %v1149_v59 }
 0x3f0   : > { %v1152_v60 = vpop.xlane.xlu0 %1151 }
 0x3f1   : > { %1915 = vrcp.f32 %v1152_v60 }
 0x3f7   : > { %v1914_v61 = vpop.eup %1913 }
 0x3f8   : > { %v1155_v63 = vpop.xlane.xlu1 %1154  ;;  %v2546_v0 = vmul.f32 %v1914_v61, %v1898_v29 }
 0x3f9   : > { %1917 = vrcp.f32 %v1155_v63 }
 0x3fa   : > { %v1274_v1 = vsel %vm1098_vm1, %v2546_v0, 0.0 }
 0x3fb   : > { %v1916_v2 = vpop.eup %1915  ;;  %v1275_v3 = vrot.slane %v1274_v1, 4 }
 0x3fc   : > { %v2550_v4 = vmul.f32 %v1916_v2, %v1900_v50 }
 0x3fd   : > { %v1276_v6 = vadd.f32 %v1275_v3, %v1274_v1 }
 0x3fe   : > { %v1281_v23 = vsel %vm1098_vm1, %v2550_v4, 0.0 }
 0x3ff   : > { %v1277_v24 = vrot.slane %v1276_v6, 2  ;;  %v1282_v26 = vrot.slane %v1281_v23, 4 }
 0x400   : > { %v1158_v27 = vpop.xlane.xlu0 %1157 }
 0x401   : > { %1919 = vrcp.f32 %v1158_v27  ;;  %v1278_v28 = vadd.f32 %v1277_v24, %v1276_v6  ;;  %v1283_v48 = vadd.f32 %v1282_v26, %v1281_v23 }
 0x403   : > { %v1918_v29 = vpop.eup %1917  ;;  %v1279_v30 = vrot.slane %v1278_v28, 1  ;;  %v1284_v31 = vrot.slane %v1283_v48, 2 }
 0x404   : > { %v2554_v32 = vmul.f32 %v1918_v29, %v1902_v35 }
 0x405   : > { %v1280_v34 = vadd.f32 %v1279_v30, %v1278_v28  ;;  %v1285_v56 = vadd.f32 %v1284_v31, %v1283_v48  ;;  %v2133_v28 = vmov 1983009808  }
 0x406   : > { %v1288_v50 = vsel %vm1098_vm1, %v2554_v32, 0.0  ;;  %v1189_v48 = vunpack.c.l.s4 %v2133_v28 }
 0x407   : > { %v1330_v62 = vmul.f32 0.25, %v1280_v34  ;;  %v1286_v25 = vrot.slane %v1285_v56, 1  ;;  %v1289_v36 = vrot.slane %v1288_v50, 4 }
 0x408   : > { %v1161_v22 = vpop.xlane.xlu1 %1160 }
 0x409   : > { %1921 = vrcp.f32 %v1161_v22  ;;  %1343 = vbcast.lane.b32.xlu0 %v1330_v62, 264  ;;  %1339 = vbcast.lane.b32.xlu1 %v1330_v62, 256  ;;  %v1287_v37 = vadd.f32 %v1286_v25, %v1285_v56  ;;  %v1290_v38 = vadd.f32 %v1289_v36, %v1288_v50 }
 0x40b   : > { %v1920_v40 = vpop.eup %1919  ;;  %v1331_v41 = vmul.f32 0.25, %v1287_v37  ;;  %v1291_v33 = vrot.slane %v1290_v38, 2 }
 0x40c   : > { %v1167_v42 = vpop.xlane.xlu1 %1166  ;;  %v1182_v35 = vmul.f32 %v1920_v40, %v2526_v39 }
 0x40d   : > { %1923 = vrcp.f32 %v1167_v42  ;;  %1346 = vbcast.lane.b32.xlu1 %v1331_v41, 256  ;;  %v1292_v43 = vadd.f32 %v1291_v33, %v1290_v38  ;;  %v2134_v38 = vmov 1934713408   ;;  %v1187_v42 = vcombine.low %v2546_v0, %v2554_v32 }
 0x40e   : > { %v1295_v44 = vsel %vm1098_vm1, %v1182_v35, 0.0  ;;  %v1195_v37 = vcombine.low %v2550_v4, %v1182_v35  ;;  %v1222_v40 = vunpack.c.l.s4 %v2134_v38 }
 0x40f   : > { %v1293_v47 = vrot.slane %v1292_v43, 1  ;;  %v1296_v49 = vrot.slane %v1295_v44, 4 }
 0x410   : > { %v1164_v52 = vpop.xlane.xlu0 %1163 }
 0x411   : > { %1925 = vrcp.f32 %v1164_v52  ;;  %1350 = vbcast.lane.b32.xlu1 %v1331_v41, 264  ;;  %v1294_v53 = vadd.f32 %v1293_v47, %v1292_v43  ;;  %v1297_v55 = vadd.f32 %v1296_v49, %v1295_v44 }
 0x413   : > { %v1922_v58 = vpop.eup %1921  ;;  %v1332_v59 = vmul.f32 0.25, %v1294_v53  ;;  %v1298_v60 = vrot.slane %v1297_v55, 2 }
 0x414   : > { %v1183_v61 = vmul.f32 %v1922_v58, %v2530_v46  ;;  %v1223_v58 = vunpack.c.0.s8 %v1222_v40 }
 0x415   : > { %1357 = vbcast.lane.b32.xlu0 %v1332_v59, 264  ;;  %1353 = vbcast.lane.b32.xlu1 %v1332_v59, 256  ;;  %v1299_v39 = vadd.f32 %v1298_v60, %v1297_v55 }
 0x416   : > { %v1302_v63 = vsel %vm1098_vm1, %v1183_v61, 0.0 }
 0x417   : > { %v1924_v1 = vpop.eup %1923  ;;  %v1300_v2 = vrot.slane %v1299_v39, 1  ;;  %v1303_v3 = vrot.slane %v1302_v63, 4 }
 0x418   : > { %v1170_v6 = vpop.xlane.xlu0 %1169  ;;  %v1185_v23 = vmul.f32 %v1924_v1, %v2534_v51  ;;  %v1190_v51 = vunpack.c.0.s8 %v1189_v48 }
 0x419   : > { %1927 = vrcp.f32 %v1170_v6  ;;  %v1301_v24 = vadd.f32 %v1300_v2, %v1299_v39  ;;  %v1304_v26 = vadd.f32 %v1303_v3, %v1302_v63  ;;  %v1226_v2 = vsub.s32 %v1223_v58, %v2481_v45 }
 0x41a   : > { %v1316_v27 = vsel %vm1098_vm1, %v1185_v23, 0.0  ;;  %v1203_v52 = vcombine.low %v1183_v61, %v1185_v23 }
 0x41b   : > { %v1926_v29 = vpop.eup %1925  ;;  %v1333_v46 = vmul.f32 0.25, %v1301_v24  ;;  %v1305_v30 = vrot.slane %v1304_v26, 2  ;;  %v1317_v31 = vrot.slane %v1316_v27, 4 }
 0x41c   : > { %v1184_v34 = vmul.f32 %v1926_v29, %v2538_v54  ;;  %v1193_v54 = vsub.s32 %v1190_v51, %v2481_v45 }
 0x41d   : > { %1364 = vbcast.lane.b32.xlu0 %v1333_v46, 264  ;;  %1360 = vbcast.lane.b32.xlu1 %v1333_v46, 256  ;;  %v1306_v56 = vadd.f32 %v1305_v30, %v1304_v26  ;;  %v1318_v50 = vadd.f32 %v1317_v31, %v1316_v27 }
 0x41e   : > { %v1309_v62 = vsel %vm1098_vm1, %v1184_v34, 0.0  ;;  %v1202_v55 = vrot.slane %v1195_v37, %v1193_v54  ;;  %v1194_v60 = vrot.slane %v1187_v42, %v1193_v54  ;;  %v1210_v63 = vrot.slane %v1203_v52, %v1193_v54 }
 0x41f   : > { %v1307_v25 = vrot.slane %v1306_v56, 1  ;;  %v1310_v36 = vrot.slane %v1309_v62, 4  ;;  %v1319_v22 = vrot.slane %v1318_v50, 2 }
 0x420   : > { %v1219_v3 = vcombine.low %v1194_v60, %v1202_v55 }
 0x421   : > { %v1308_v41 = vadd.f32 %v1307_v25, %v1306_v56  ;;  %v1311_v33 = vadd.f32 %v1310_v36, %v1309_v62  ;;  %v1320_v49 = vadd.f32 %v1319_v22, %v1318_v50 }
 0x422   : > { %v2573_v27 = vrot.slane %v1219_v3, %v1226_v2 }
 0x423   : > { %v1928_v43 = vpop.eup %1927  ;;  %v1334_v44 = vmul.f32 0.25, %v1308_v41  ;;  %v1312_v47 = vrot.slane %v1311_v33, 2  ;;  %v1321_v0 = vrot.slane %v1320_v49, 1 }
 0x424   : > { %v1186_v53 = vmul.f32 %v1928_v43, %v2542_v57 }
 0x425   : > { %1371 = vbcast.lane.b32.xlu0 %v1334_v44, 264  ;;  %1367 = vbcast.lane.b32.xlu1 %v1334_v44, 256  ;;  %v1313_v4 = vadd.f32 %v1312_v47, %v1311_v33  ;;  %v1322_v24 = vadd.f32 %v1321_v0, %v1320_v49 }
 0x426   : > { %v1211_v35 = vcombine.low %v1184_v34, %v1186_v53  ;;  %v1323_v59 = vsel %vm1098_vm1, %v1186_v53, 0.0  ;;  %v1220_v34 = vcombine.high %v1194_v60, %v1202_v55 }
 0x427   : > { %v1314_v39 = vrot.slane %v1313_v4, 1  ;;  %v1324_v32 = vrot.slane %v1323_v59, 4  ;;  %v1336_v46 = vmul.f32 0.25, %v1322_v24 }
 0x428   : > { %v1218_v1 = vrot.slane %v1211_v35, %v1193_v54  ;;  %v1234_v62 = vrot.slane %v1220_v34, %v1226_v2 }
 0x429   : > { %v1315_v61 = vadd.f32 %v1314_v39, %v1313_v4  ;;  %v1325_v6 = vadd.f32 %v1324_v32, %v1323_v59 }
 0x42a   : > { %v1235_v57 = vcombine.low %v1210_v63, %v1218_v1  ;;  %v1236_v45 = vcombine.high %v1210_v63, %v1218_v1 }
 0x42b   : > { %v1335_v23 = vmul.f32 0.25, %v1315_v61  ;;  %v1326_v26 = vrot.slane %v1325_v6, 2 }
 0x42c   : > { %v2575_v28 = vrot.slane %v1235_v57, %v1226_v2  ;;  %v1250_v50 = vrot.slane %v1236_v45, %v1226_v2 }
 0x42d   : > { %1378 = vbcast.lane.b32.xlu0 %v1335_v23, 264  ;;  %1374 = vbcast.lane.b32.xlu1 %v1335_v23, 256  ;;  %v1327_v48 = vadd.f32 %v1326_v26, %v1325_v6 }
 0x42e   : > { %v1251_v29 = vcombine.low %v2573_v27, %v2575_v28  ;;  %v1253_v51 = vcombine.low %v1234_v62, %v1250_v50  ;;  %v1252_v25 = vcombine.high %v2573_v27, %v2575_v28  ;;  %v1254_v36 = vcombine.high %v1234_v62, %v1250_v50 }
 0x42f   : > { %v1328_v30 = vrot.slane %v1327_v48, 1 }
 0x431   : > { %1385 = vbcast.lane.b32.xlu0 %v1336_v46, 264  ;;  %1381 = vbcast.lane.b32.xlu1 %v1336_v46, 256  ;;  %v1329_v31 = vadd.f32 %v1328_v30, %v1327_v48 }
 0x433   : > { %v1337_v56 = vmul.f32 0.25, %v1329_v31 }
 0x435   : > { %1392 = vbcast.lane.b32.xlu0 %v1337_v56, 264  ;;  %1388 = vbcast.lane.b32.xlu1 %v1337_v56, 256 }
 0x439   : > { %1260 = vrot.lane.b32.xlu0 %v1253_v51, %s2135_s18  ;;  %1256 = vrot.lane.b32.xlu1 %v1252_v25, %s2136_s11 }
 0x43d   : > { %1264 = vrot.lane.b32.xlu1 %v1254_v36, %s2137_s14 }
 0x47b   : > { %v1340_v22 = vpop.permute.xlu1 %1339  ;;  %v1344_v40 = vpop.permute.xlu0 %1343 }
 0x47c   : > { %v1395_v44 = vmul.f32 %v1344_v40, %v2397_v7  ;;  %v1394_v53 = vmul.f32 %v1340_v22, %v2392_v5 }
 0x47f   : > { %v1347_v37 = vpop.permute.xlu1 %1346 }
 0x480   : > { %v1396_v47 = vmul.f32 %v1347_v37, %v2400_v8 }
 0x482   : > { %v1419_v35 = vsel %vm392_vm0, %v1396_v47, 0.0 }
 0x483   : > { %v1351_v38 = vpop.permute.xlu1 %1350 }
 0x484   : > { %v1397_v42 = vmul.f32 %v1351_v38, %v2407_v9  ;;  %v1411_v9 = vsel %vm392_vm0, %v1395_v44, 0.0 }
 0x486   : > { %v1420_v4 = vsel %vm392_vm0, %v1397_v42, 0.0 }
 0x487   : > { %v1358_v41 = vpop.permute.xlu0 %1357  ;;  %v1354_v33 = vpop.permute.xlu1 %1353  ;;  %v1421_v59 = vadd.f32 %v1420_v4, %v1419_v35 }
 0x488   : > { %v1399_v49 = vmul.f32 %v1358_v41, %v2417_v11  ;;  %v1398_v52 = vmul.f32 %v1354_v33, %v2410_v10  ;;  %v1410_v11 = vsel %vm392_vm0, %v1394_v53, 0.0 }
 0x489   : > { %v1412_v32 = vadd.f32 %v1411_v9, %v1410_v11  ;;  %v1422_v1 = vrot.slane %v1421_v59, 4 }
 0x48a   : > { %v1429_v7 = vsel %vm392_vm0, %v1399_v49, 0.0  ;;  %v1428_v8 = vsel %vm392_vm0, %v1398_v52, 0.0 }
 0x48b   : > { %v1413_v57 = vrot.slane %v1412_v32, 4  ;;  %v1423_v24 = vadd.f32 %v1422_v1, %v1421_v59 }
 0x48d   : > { %v1414_v45 = vadd.f32 %v1413_v57, %v1412_v32  ;;  %v1424_v34 = vrot.slane %v1423_v24, 2 }
 0x48f   : > { %v1365_v54 = vpop.permute.xlu0 %1364  ;;  %v1361_v43 = vpop.permute.xlu1 %1360  ;;  %v1415_v40 = vrot.slane %v1414_v45, 2 }
 0x490   : > { %v1401_v55 = vmul.f32 %v1365_v54, %v2427_v13  ;;  %v1400_v58 = vmul.f32 %v1361_v43, %v2420_v12  ;;  %v1430_v12 = vadd.f32 %v1429_v7, %v1428_v8 }
 0x492   : > { %v1438_v10 = vsel %vm392_vm0, %v1401_v55, 0.0  ;;  %v1437_v5 = vsel %vm392_vm0, %v1400_v58, 0.0  ;;  %v1431_v6 = vrot.slane %v1430_v12, 4 }
 0x493   : > { %v1439_v63 = vadd.f32 %v1438_v10, %v1437_v5 }
 0x494   : > { %v1432_v30 = vadd.f32 %v1431_v6, %v1430_v12 }
 0x495   : > { %v1440_v23 = vrot.slane %v1439_v63, 4 }
 0x496   : > { %v1433_v22 = vrot.slane %v1432_v30, 2 }
 0x497   : > { %v1372_v13 = vpop.permute.xlu0 %1371  ;;  %v1368_v60 = vpop.permute.xlu1 %1367  ;;  %v1441_v31 = vadd.f32 %v1440_v23, %v1439_v63 }
 0x498   : > { %v1403_v39 = vmul.f32 %v1372_v13, %v2437_v15  ;;  %v1402_v0 = vmul.f32 %v1368_v60, %v2430_v14  ;;  %v1434_v52 = vadd.f32 %v1433_v22, %v1432_v30 }
 0x49a   : > { %v1447_v2 = vsel %vm392_vm0, %v1403_v39, 0.0  ;;  %v1446_v3 = vsel %vm392_vm0, %v1402_v0, 0.0  ;;  %v1435_v5 = vrot.slane %v1434_v52, 1 }
 0x49b   : > { %v1448_v61 = vadd.f32 %v1447_v2, %v1446_v3 }
 0x49d   : > { %v1449_v26 = vrot.slane %v1448_v61, 4 }
 0x49f   : > { %v1379_v48 = vpop.permute.xlu0 %1378  ;;  %v1375_v46 = vpop.permute.xlu1 %1374  ;;  %v1450_v56 = vadd.f32 %v1449_v26, %v1448_v61 }
 0x4a0   : > { %v1405_v15 = vmul.f32 %v1379_v48, %v2447_v17  ;;  %v1404_v14 = vmul.f32 %v1375_v46, %v2440_v16  ;;  %v1442_v17 = vrot.slane %v1441_v31, 2  ;;  %v1425_v16 = vadd.f32 %v1424_v34, %v1423_v24 }
 0x4a1   : > { %v1451_v33 = vrot.slane %v1450_v56, 2 }
 0x4a2   : > { %v1456_v50 = vsel %vm392_vm0, %v1405_v15, 0.0  ;;  %v1455_v62 = vsel %vm392_vm0, %v1404_v14, 0.0  ;;  %v1443_v55 = vadd.f32 %v1442_v17, %v1441_v31  ;;  %v1426_v9 = vrot.slane %v1425_v16, 1 }
 0x4a3   : > { %v1457_v51 = vadd.f32 %v1456_v50, %v1455_v62  ;;  %v1386_v25 = vpop.permute.xlu0 %1385  ;;  %v1382_v36 = vpop.permute.xlu1 %1381  ;;  %v1452_v35 = vadd.f32 %v1451_v33, %v1450_v56 }
 0x4a4   : > { %v1407_v37 = vmul.f32 %v1386_v25, %v2457_v19  ;;  %v1406_v38 = vmul.f32 %v1382_v36, %v2450_v18  ;;  %v1416_v18 = vadd.f32 %v1415_v40, %v1414_v45  ;;  %v1444_v12 = vrot.slane %v1443_v55, 1 }
 0x4a5   : > { %v1458_v41 = vrot.slane %v1457_v51, 4  ;;  %v1427_v32 = vadd.f32 %v1426_v9, %v1425_v16  ;;  %v1453_v63 = vrot.slane %v1452_v35, 1 }
 0x4a6   : > { %v1465_v42 = vsel %vm392_vm0, %v1407_v37, 0.0  ;;  %v1464_v54 = vsel %vm392_vm0, %v1406_v38, 0.0  ;;  %v1417_v60 = vrot.slane %v1416_v18, 1  ;;  %v1445_v57 = vadd.f32 %v1444_v12, %v1443_v55 }
 0x4a7   : > { %v1459_v43 = vadd.f32 %v1458_v41, %v1457_v51  ;;  %v1466_v44 = vadd.f32 %v1465_v42, %v1464_v54  ;;  %v1393_v47 = vpop.permute.xlu0 %1392  ;;  %v1389_v49 = vpop.permute.xlu1 %1388  ;;  %v1454_v26 = vadd.f32 %v1453_v63, %v1452_v35 }
 0x4a8   : > { %v1409_v53 = vmul.f32 %v1393_v47, %v2467_v21  ;;  %v1408_v19 = vmul.f32 %v1389_v49, %v2460_v20  ;;  %v1418_v6 = vadd.f32 %v1417_v60, %v1416_v18 }
 0x4a9   : > { %v1460_v58 = vrot.slane %v1459_v43, 2  ;;  %v1467_v4 = vrot.slane %v1466_v44, 4 }
 0x4aa   : > { %v1474_v7 = vsel %vm392_vm0, %v1409_v53, 0.0  ;;  %v1473_v8 = vsel %vm392_vm0, %v1408_v19, 0.0 }
 0x4ab   : > { %v2613_v11 = vadd.f32 %v1460_v58, %v1459_v43  ;;  %v1468_v59 = vadd.f32 %v1467_v4, %v1466_v44  ;;  %v1475_v10 = vadd.f32 %v1474_v7, %v1473_v8  ;;  %v1257_v21 = vpop.permute.xlu1 %1256  ;;  %v1261_v20 = vpop.permute.xlu0 %1260 }
 0x4ac   : > { %v1268_v13 = vsel %vm1267_vm2, %v1251_v29, %v1257_v21  ;;  %v1436_v29 = vadd.f32 %v1435_v5, %v1434_v52 }
 0x4ad   : > { %v1469_v39 = vrot.slane %v1468_v59, 2  ;;  %v1476_v0 = vrot.slane %v1475_v10, 4  ;;  %v1462_v1 = vrot.slane %v2613_v11, 1  ;;  %v1269_v27 = vsel %vm392_vm0, %v1268_v13, %v1261_v20 }
 0x4af   : > { %v1470_v2 = vadd.f32 %v1469_v39, %v1468_v59  ;;  %v1477_v3 = vadd.f32 %v1476_v0, %v1475_v10  ;;  %v1265_v28 = vpop.permute.xlu1 %1264 }
 0x4b0   : > { %v1271_v61 = vsel %vm1270_vm3, %v1269_v27, %v1265_v28 }
 0x4b1   : > { %v1471_v23 = vrot.slane %v1470_v2, 1  ;;  %v1478_v24 = vrot.slane %v1477_v3, 2  ;;  %1273 = vst.msk [vmem:[%s362_s20] sm:$0xff] %vm1272_vm4, %v1271_v61 }
 0x4b2   : > { %2030 = shalt.err (!%p2027_p6)
}
 0x4b3   : > { %s2031_s23 = scalar_lea.hbm %s2627_s2, 128  ;;  %s2035_s18 = scalar_lea.hbm %s2717_s7, 256 }
 0x4b4   : > { %p2032_p8 = scmp.ne.s32.totalorder %s2627_s2, %s2031_s23  ;;  %p2036_p4 = scmp.lt.u32.totalorder %s2627_s2, %s2717_s7 }
 0x4b5   : > { %p2037_p11 = scmp.lt.u32.totalorder %s2035_s18, %s2031_s23  ;;  %p2039_p3 = scmp.lt.u32.totalorder %s2031_s23, %s2627_s2 }
 0x4b6   : > { %p2033_p10 = pnand %p2032_p8, %p2274_p12 }
 0x4b7   : > { %p2038_p13 = por %p2037_p11, %p2036_p4 }
 0x4b8   : > { %p2034_p0 = pneg %p2033_p10 }
 0x4b9   : > { %p2040_p7 = por %p2039_p3, %p2038_p13 }
 0x4bb   : > { %p2041_p9 = pnand %p2040_p7, %p2034_p0 }
 0x4bd   : > { %2044 = shalt.err (!%p2041_p9)
}
 0x4be   : > { %1827 = dma.vmem_to_hbm [thread:$0]  (%p2274_p12), %s2629_s21, 128, %s2627_s2, %s1512_s9   ;;  %v1491_v48 = vsel %vm1490_vm5, %v1427_v32, %v1418_v6  ;;  %vm1496_vm8 = vcmask 1044484   ;;  %v1463_v46 = vadd.f32 %v1462_v1, %v2613_v11  ;;  %v1479_v30 = vadd.f32 %v1478_v24, %v1477_v3 }
 0x4bf   : > { %v1493_v15 = vsel %vm1492_vm6, %v1436_v29, %v1491_v48  ;;  %vm1498_vm9 = vcmask 1045509   ;;  %v1472_v14 = vadd.f32 %v1471_v23, %v1470_v2  ;;  %vm1500_vm10 = vcmask 1046534   ;;  %s355_s20 = scalar_lea.vmem [#allocation8], %s2378_s26  ;;  %s2665_s2 = scalar_lea.hbm %s2716_s6, %s1708_s13 }
 0x4c0   : > { %v1495_v45 = vsel %vm1494_vm7, %v1445_v57, %v1493_v15  ;;  %v1480_v31 = vrot.slane %v1479_v30, 1  ;;  %s1525_s29 = sshll.u32 %s355_s20, 4  ;;  %vm1502_vm11 = vcmask 1047559   ;;  %s1507_s26 = scalar_lea.sflag [#allocation4], %s2366_s17  ;;  %s2667_s29 = int_to_ptr.vmem [resolvable:$true] %s1525_s29 }
 0x4c1   : > { %v1497_v34 = vsel %vm1496_vm8, %v1454_v26, %v1495_v45  ;;  %s2045_s9 = scalar_lea.vmem %s2667_s29, 128  ;;  %s2139_s28 = smov [#allocation8]  }
 0x4c2   : > { %v1499_v56 = vsel %vm1498_vm9, %v1463_v46, %v1497_v34  ;;  %v1481_v50 = vadd.f32 %v1480_v31, %v1479_v30  ;;  %p2046_p1 = scmp.ne.s32.totalorder %s2667_s29, %s2045_s9  ;;  %s2049_s16 = sshll.u32 %s2139_s28, 4  ;;  %s2050_s16 = int_to_ptr.vmem [resolvable:$false] %s2049_s16 }
 0x4c3   : > { %v1501_v62 = vsel %vm1500_vm10, %v1472_v14, %v1499_v56  ;;  %s2051_s30 = scalar_lea.vmem %s2050_s16, 256  ;;  %p2052_p6 = scmp.lt.s32.totalorder %s2667_s29, %s2050_s16 }
 0x4c4   : > { %v1503_v51 = vsel %vm1502_vm11, %v1481_v50, %v1501_v62  ;;  %p2047_p5 = pnand %p2046_p1, %p2274_p12  ;;  %p2053_p8 = scmp.lt.s32.totalorder %s2051_s30, %s2045_s9 }
 0x4c5   : > { %1505 = vst.msk [vmem:[%s355_s20] sm:$0xff] %vm392_vm0, %v1503_v51 }
 0x4c6   : > { %p2048_p2 = pneg %p2047_p5  ;;  %p2054_p10 = por %p2053_p8, %p2052_p6 }
 0x4c8   : > { %p2055_p0 = pnand %p2054_p10, %p2048_p2 }
 0x4ca   : > { %2058 = shalt.err (!%p2055_p0)
}
 0x4cb   : > { %s2059_s17 = scalar_lea.hbm %s2665_s2, 128  ;;  %s2063_s15 = scalar_lea.hbm %s2716_s6, 256 }
 0x4cc   : > { %p2060_p4 = scmp.ne.s32.totalorder %s2665_s2, %s2059_s17  ;;  %p2064_p3 = scmp.lt.u32.totalorder %s2665_s2, %s2716_s6 }
 0x4cd   : > { %p2065_p7 = scmp.lt.u32.totalorder %s2063_s15, %s2059_s17  ;;  %p2067_p1 = scmp.lt.u32.totalorder %s2059_s17, %s2665_s2 }
 0x4ce   : > { %p2061_p11 = pnand %p2060_p4, %p2274_p12 }
 0x4cf   : > { %p2066_p9 = por %p2065_p7, %p2064_p3 }
 0x4d0   : > { %p2062_p13 = pneg %p2061_p11 }
 0x4d1   : > { %p2068_p5 = por %p2067_p1, %p2066_p9 }
 0x4d3   : > { %p2069_p2 = pnand %p2068_p5, %p2062_p13 }
 0x4d5   : > { %2072 = shalt.err (!%p2069_p2)
}
 0x4d6   : > { %1826 = dma.vmem_to_hbm [thread:$0]  (%p2274_p12), %s2667_s29, 128, %s2665_s2, %s1507_s26  }
 0x4d7 PF: > { %s1550_s0 = sand.u32 1, %s2111_s24   ;;  %p2747_p6 = scmp.ne.s32.totalorder %s2730_s8, 0 }
 0x4d8   : > { %p2748_p8 = scmp.ge.s32.totalorder %s2123_s27, 2  ;;  %s1551_s18 = scalar_lea.sflag [#allocation4], %s1550_s0 }
 0x4da   : > { %p1842_p10 = pnand %p2748_p8, %p2747_p6 }
 0x4dc   : > { %2102 = dma.done.wait (!%p1842_p10), %s1551_s18, 128  }
 0x4dd   : > { %2104 = vsyncadd (!%p1842_p10), %s1551_s18, 4294967168  ;;  %s1560_s11 = scalar_lea.sflag [#allocation10], %s1550_s0 }
 0x4de   : > { %2106 = dma.done.wait (!%p1842_p10), %s1560_s11, 128  }
 0x4df   : > { %2108 = vsyncadd (!%p1842_p10), %s1560_s11, 4294967168  ;;  %s2749_s27 = sld [smem:[#allocation17_spill]]  ;;  %s2750_s19 = sld [smem:[#allocation16_spill]] }
 0x4e0   : > { %s2751_s26 = sld [smem:[#allocation18_spill]]  ;;  %s2752_s24 = smov %s2115_s25 }
 0x4e5   : > { %p27_p12 = scmp.ge.s32.totalorder %s2749_s27, 4   ;;  %s2753_s25 = smov %s2750_s19 }
 0x4e7   :  { %29 = sbr.rel (!%p27_p12) target bundleno = 12 (0xc), region = 123 }
 0x4ee   :  { %1565 = vsyncpa [#allocation3], 1 }
 0x4ef   :  { %1567 = vsyncpa [#allocation3 + $0x1], 1 }
 0x4f0   :  { %1568 = vsyncpa [#allocation6], 1 }
 0x4f1   :  { %1570 = vsyncpa [#allocation6 + $0x1], 1 }
 0x4f2   :  { %1571 = vsyncpa [#allocation4], 1 }
 0x4f3   :  { %1573 = vsyncpa [#allocation4 + $0x1], 1 }
 0x4f4   :  { %1574 = vsyncpa [#allocation10], 1 }
 0x4f5   :  { %1576 = vsyncpa [#allocation10 + $0x1], 1 }

</bundles_post_ra>
